<compile_context>
chip_gen: v7x
topology: tpu7x:2x2x1
jax: 0.10.0
libtpu: 0.0.40
codegen_flags: <defaults>
</compile_context>

<pallas_src>
import functools

import jax
import jax.numpy as jnp
from jax.experimental import pallas as pl
from jax.experimental.pallas import tpu as pltpu


# --------------------------------------------------------------------------
# Kernels
# --------------------------------------------------------------------------
def _branch_quant_mix_kernel(x_ref, inv_s_ref, post_s_ref, o_ref, *, n_levels):
    """Fake-quantize x per branch and mix with softmax weights.

    x_ref      : VMEM f32 (R, C)   tensor to quantize (rows = cout)
    inv_s_ref  : VMEM f32 (R, nb)  n_i / quant-scale per (row, branch)
    post_s_ref : VMEM f32 (R, nb)  quant-scale / n_i * softmax weight per (row, branch)
    o_ref      : VMEM f32 (R, C)   sum_i dequant_i(x) * sw_i
    n_levels   : static tuple of per-branch quantization levels (folded into tables).
    """
    x = x_ref[...]
    inv_s = inv_s_ref[...]           # load once, slice in registers (hoisted)
    post_s = post_s_ref[...]
    acc = jnp.zeros(x.shape, jnp.float32)
    for i, n in enumerate(n_levels):                 # bits are static -> unrolled
        a = jnp.clip(x * inv_s[:, i:i + 1], -n, n)   # == clamp(x/es, -1, 1) * n
        acc = acc + jnp.round(a) * post_s[:, i:i + 1]
    o_ref[...] = acc


def _conv_matmul_kernel(w_ref, b_ref, p_ref, o_ref):
    """out[n, co_tile, m_tile] = W_tile @ patches[n, :, m_tile] + bias_tile."""
    acc = jnp.dot(w_ref[...], p_ref[0], preferred_element_type=jnp.float32)
    o_ref[0] = acc + b_ref[...]


# --------------------------------------------------------------------------
# Wrapper helpers
# --------------------------------------------------------------------------
def _cdiv(a, b):
    return -(-a // b)


def _round_up(a, b):
    return _cdiv(a, b) * b


def _tpu_vmem_bytes():
    try:
        cap = getattr(pltpu.get_tpu_info(), "vmem_capacity_bytes", None)
        if cap:
            return int(cap)
    except Exception:
        pass
    return 64 * 1024 * 1024          # conservative (v7x per-TC VMEM)


def _pick_m_tile(m_per_image, k, n_images, n_co_tiles, tco, vmem_budget_bytes):
    """Lane tile along OH*OW: sized by per-step DMA bytes + VMEM budget,
    keeping >=4 total grid steps when possible (v7x 2-TC double buffering)."""
    lane = 128
    if m_per_image <= lane:
        return m_per_image                       # full-extent block (exempt from 128-rule)
    # Per output column per step: double-buffered bf16 patch col + f32 output col.
    per_col = 2 * k * 2 + 2 * tco * 4
    by_vmem = max(lane, (max(vmem_budget_bytes, 2 * 1024 * 1024) // per_col) // lane * lane)
    # Target ~4 MiB of patch DMA per step so the ~0.35 us per-step cost is hidden.
    by_dma = max(lane, ((4 * 1024 * 1024) // (2 * k)) // lane * lane)
    tm = min(by_vmem, by_dma, _round_up(m_per_image, lane))
    while tm > lane and n_images * n_co_tiles * _cdiv(m_per_image, tm) < 4:
        tm = max(lane, (tm // 2) // lane * lane)
    return tm


def _branch_scales(scale_params, bits, cout):
    """Effective per-branch quant scale, broadcast to (cout,)."""
    es_list = []
    for bit, sp in zip(bits, scale_params):
        sp = jnp.asarray(sp, jnp.float32)
        if bit != 2:              # round_pow2 branches: scale_param is a raw scale
            es = jnp.exp2(jnp.floor(jnp.log2(sp)))
        else:                     # bit == 2 branch: scale_param is a log-scale
            es = jnp.exp(sp)
        es_list.append(jnp.broadcast_to(es, (cout,)))
    return es_list


# --------------------------------------------------------------------------
# Forward
# --------------------------------------------------------------------------
def shared_multiprec_conv2d(x, temp, alpha_weight, weight, bias, scale_params,
                            bits, abits, act_scale, stride=(1, 1), padding=(1, 1)):
    """JAX/Pallas forward of SharedMultiPrecConv2d (gumbel=False path)."""
    nb = len(bits)
    cout, cin, kh, kw = weight.shape
    K = cin * kh * kw
    x = jnp.asarray(x, jnp.float32)
    weight = jnp.asarray(weight, jnp.float32)

    # sw = softmax(alpha_weight / temp, dim=0)  -- tiny, wrapper-side
    sw = jax.nn.softmax(jnp.asarray(alpha_weight, jnp.float32) / temp, axis=0)

    es_list = _branch_scales(scale_params, bits, cout)             # nb x (cout,)
    n_levels = tuple(float(2 ** (b - 1) - 1) for b in bits)

    # ---- weight fake-quant + mix (Pallas; weights are small -> single block) ----
    # n folded into the tables: x*(n/es) -> clip(-n,n) -> round -> *(es/n*sw).
    inv_cn = jnp.stack([n / es for n, es in zip(n_levels, es_list)], axis=1)        # (cout, nb)
    post_cn = jnp.stack([es / n * sw[i]
                         for i, (n, es) in enumerate(zip(n_levels, es_list))], axis=1)
    w2 = weight.reshape(cout, K)
    mixed_w = pl.pallas_call(
        functools.partial(_branch_quant_mix_kernel, n_levels=n_levels),
        out_shape=jax.ShapeDtypeStruct((cout, K), jnp.float32),
        grid=(1,),
        in_specs=[pl.BlockSpec((cout, K), lambda i: (0, 0)),
                  pl.BlockSpec((cout, nb), lambda i: (0, 0)),
                  pl.BlockSpec((cout, nb), lambda i: (0, 0))],
        out_specs=pl.BlockSpec((cout, K), lambda i: (0, 0)),
    )(w2, inv_cn, post_cn)
    mixed_w_bf16 = mixed_w.astype(jnp.bfloat16)      # bf16 feed for the MXU matmul (tiny cast)

    # ---- bias fake-quant + mix: (cout,)-sized -> plain jnp, no kernel launch ----
    if bias is not None:
        b = jnp.asarray(bias, jnp.float32)
        n_b = float(2 ** 15 - 1)                     # b_prec = 16
        n_a = float(2 ** abits[0] - 1)
        act_scale = jnp.asarray(act_scale, jnp.float32)
        mixed_b = jnp.zeros((cout,), jnp.float32)
        for i, (n_w, es) in enumerate(zip(n_levels, es_list)):
            sb = n_b * (es / n_w) * (act_scale / n_a)
            qb = jnp.round(jnp.clip(b / sb, -1.0, 1.0) * n_b) / n_b * sb
            mixed_b = mixed_b + qb * sw[i]
    else:
        mixed_b = jnp.zeros((cout,), jnp.float32)
    mixed_b = mixed_b.reshape(cout, 1)

    # ---- conv2d = batch-major im2col (bf16, single materialization, no pads /
    #      expanded-tensor transposes) + Pallas MXU matmul, lane-dense output ----
    N, cin_x, H, W = x.shape
    assert cin_x == cin, "groups != 1 not supported"   # TODO(synk): groups / dilation != 1
    s_h, s_w = stride
    p_h, p_w = padding
    OH = (H + 2 * p_h - kh) // s_h + 1
    OW = (W + 2 * p_w - kw) // s_w + 1
    Mn = OH * OW

    xb = x.astype(jnp.bfloat16)
    xpad = jnp.pad(xb, ((0, 0), (0, 0), (p_h, p_h), (p_w, p_w))) if (p_h or p_w) else xb
    slabs = []
    for i in range(kh):
        for j in range(kw):
            slabs.append(xpad[:, :, i:i + (OH - 1) * s_h + 1:s_h,
                                    j:j + (OW - 1) * s_w + 1:s_w])    # (N, cin, OH, OW)
    # (N, cin, kh*kw, OH, OW) -> contiguous reshape; K-order (cin, kh, kw)
    # matches weight.reshape(cout, K). No transpose of the expanded tensor.
    patches = jnp.stack(slabs, axis=2).reshape(N, K, Mn)

    # Generation-aware VMEM budgeting / tile sizing.
    vmem_cap = _tpu_vmem_bytes()
    vmem_limit = vmem_cap // 2                       # ~32 MiB on v7x, ~64 MiB on v5e/v6e
    TCO = cout if cout <= 256 else 256               # MXU-native cout tile for big layers
    n_co = _cdiv(cout, TCO)
    budget = vmem_limit * 3 // 4 - (2 * TCO * K * 2 + 2 * TCO * 4)   # minus resident W/bias
    TM = _pick_m_tile(Mn, K, N, n_co, TCO, budget)
    n_m = _cdiv(Mn, TM)                              # ragged last tile handled by masking

    out = pl.pallas_call(
        _conv_matmul_kernel,
        out_shape=jax.ShapeDtypeStruct((N, cout, Mn), jnp.float32),
        grid=(N, n_co, n_m),
        in_specs=[pl.BlockSpec((TCO, K), lambda n, c, m: (c, 0)),        # mixed weight (resident)
                  pl.BlockSpec((TCO, 1), lambda n, c, m: (c, 0)),        # mixed bias (resident)
                  pl.BlockSpec((1, K, TM), lambda n, c, m: (n, 0, m))],  # patch tile (lane-dense)
        out_specs=pl.BlockSpec((1, TCO, TM), lambda n, c, m: (n, c, m)),
        compiler_params=pltpu.CompilerParams(
            dimension_semantics=("parallel", "parallel", "parallel"),
            vmem_limit_bytes=vmem_limit),
    )(mixed_w_bf16, mixed_b, patches)

    return out.reshape(N, cout, OH, OW)              # already batch-major -> free reshape


# --------------------------------------------------------------------------
# Pure-JAX reference (mirrors the PyTorch module)
# --------------------------------------------------------------------------
def _reference_forward(x, temp, alpha_weight, weight, bias, scale_params,
                       bits, abits, act_scale, stride, padding):
    sw = jax.nn.softmax(alpha_weight / temp, axis=0)
    cout = weight.shape[0]
    mixed_w = jnp.zeros_like(weight)
    mixed_b = jnp.zeros_like(bias) if bias is not None else None
    n_b = 2.0 ** 15 - 1.0
    n_a = 2.0 ** abits[0] - 1.0
    for i, bit in enumerate(bits):
        sp = jnp.asarray(scale_params[i], jnp.float32)
        es = jnp.exp2(jnp.floor(jnp.log2(sp))) if bit != 2 else jnp.exp(sp)
        n_w = 2.0 ** (bit - 1) - 1.0
        es4 = es.reshape(-1, 1, 1, 1)
        xq = jnp.clip(weight / es4, -1.0, 1.0)
        qw = jnp.round(xq * n_w) / n_w * es4
        mixed_w = mixed_w + qw * sw[i].reshape(cout, 1, 1, 1)
        if bias is not None:
            sb = n_b * (es / n_w) * (act_scale / n_a)
            bq = jnp.clip(bias / sb, -1.0, 1.0)
            qb = jnp.round(bq * n_b) / n_b * sb
            mixed_b = mixed_b + qb * sw[i]
    out = jax.lax.conv_general_dilated(
        x, mixed_w, window_strides=stride,
        padding=[(padding[0], padding[0]), (padding[1], padding[1])],
        dimension_numbers=("NCHW", "OIHW", "NCHW"))
    if mixed_b is not None:
        out = out + mixed_b.reshape(1, cout, 1, 1)
    return out


if __name__ == "__main__":
    key = jax.random.PRNGKey(0)
    k_x, k_w, k_b = jax.random.split(key, 3)

    inplane, outplane = 4, 8
    ksize, stride, padding = 3, (1, 1), (1, 1)
    bits = [2, 4, 8]
    abits = [8]
    temp = 1.0
    act_scale = jnp.float32(6.0)

    x = jax.random.normal(k_x, (2, inplane, 16, 16), jnp.float32)
    weight = jax.random.normal(k_w, (outplane, inplane, ksize, ksize), jnp.float32) * 0.2
    bias = jax.random.normal(k_b, (outplane,), jnp.float32) * 0.1

    # alpha_init='same', gumbel=False -> alpha_weight filled with 0.01
    alpha_weight = jnp.full((len(bits), outplane), 0.01, jnp.float32)

    # Deterministic per-branch scale_param values.  bit==2 uses the module's
    # log-scale convention (consumed via exp()); the round_pow2 branches need a
    # positive raw scale since the module sends scale_param through log2().
    scale_params = []
    for bit in bits:
        if bit == 2:
            scale_params.append(jnp.full((outplane,), -1.94, jnp.float32))
        else:
            scale_params.append(jnp.full((1,), 0.45 + 0.05 * bit, jnp.float32))

    fwd = jax.jit(lambda xx, aw, w, b, sps, asc: shared_multiprec_conv2d(
        xx, temp, aw, w, b, sps, bits, abits, asc, stride, padding))
    out = fwd(x, alpha_weight, weight, bias, scale_params, act_scale)
    jax.block_until_ready(out)

    ref = _reference_forward(x, temp, alpha_weight, weight, bias, scale_params,
                             bits, abits, act_scale, stride, padding)
    assert out.shape == (2, outplane, 16, 16)
    assert jnp.allclose(out, ref, rtol=5e-2, atol=5e-2), float(jnp.max(jnp.abs(out - ref)))

    print("KERNEL_OK")
</pallas_src>

<mosaic_0001>
module attributes {stable_mosaic.version = 11 : i64} {
  func.func @_branch_quant_mix_kernel(%arg0: i32, %arg1: memref<8x36xf32, #tpu.memory_space<vmem>>, %arg2: memref<8x3xf32, #tpu.memory_space<vmem>>, %arg3: memref<8x3xf32, #tpu.memory_space<vmem>>, %arg4: memref<8x36xf32, #tpu.memory_space<vmem>>) attributes {dimension_semantics = [#tpu.dimension_semantics<arbitrary>], iteration_bounds = array<i64: 1>, scalar_prefetch = 0 : i64, scratch_operands = 0 : i64, tpu.core_type = #tpu.core_type<tc>, window_params = [{pipeline_mode = #tpu.pipeline_mode<synchronous>, transform_indices = @transform_0, window_bounds = array<i64: 8, 36>}, {pipeline_mode = #tpu.pipeline_mode<synchronous>, transform_indices = @transform_1, window_bounds = array<i64: 8, 3>}, {pipeline_mode = #tpu.pipeline_mode<synchronous>, transform_indices = @transform_2, window_bounds = array<i64: 8, 3>}, {pipeline_mode = #tpu.pipeline_mode<synchronous>, transform_indices = @transform_3, window_bounds = array<i64: 8, 36>}]} {
    %c0 = arith.constant 0 : index
    %c0_0 = arith.constant 0 : index
    %0 = vector.load %arg1[%c0, %c0_0] : memref<8x36xf32, #tpu.memory_space<vmem>>, vector<8x36xf32>
    %c0_1 = arith.constant 0 : index
    %c0_2 = arith.constant 0 : index
    %1 = vector.load %arg2[%c0_1, %c0_2] : memref<8x3xf32, #tpu.memory_space<vmem>>, vector<8x3xf32>
    %c0_3 = arith.constant 0 : index
    %c0_4 = arith.constant 0 : index
    %2 = vector.load %arg3[%c0_3, %c0_4] : memref<8x3xf32, #tpu.memory_space<vmem>>, vector<8x3xf32>
    %cst = arith.constant 0.000000e+00 : f32
    %3 = vector.broadcast %cst : f32 to vector<8x36xf32>
    %4 = vector.extract_strided_slice %1 {offsets = [0, 0], sizes = [8, 1], strides = [1, 1]} : vector<8x3xf32> to vector<8x1xf32>
    %5 = vector.broadcast %4 : vector<8x1xf32> to vector<8x36xf32>
    %6 = arith.mulf %0, %5 : vector<8x36xf32>
    %cst_5 = arith.constant -1.000000e+00 : f32
    %cst_6 = arith.constant 1.000000e+00 : f32
    %7 = vector.broadcast %cst_5 : f32 to vector<8x36xf32>
    %8 = arith.maximumf %7, %6 : vector<8x36xf32>
    %9 = vector.broadcast %cst_6 : f32 to vector<8x36xf32>
    %10 = arith.minimumf %9, %8 : vector<8x36xf32>
    %11 = math.roundeven %10 : vector<8x36xf32>
    %12 = vector.extract_strided_slice %2 {offsets = [0, 0], sizes = [8, 1], strides = [1, 1]} : vector<8x3xf32> to vector<8x1xf32>
    %13 = vector.broadcast %12 : vector<8x1xf32> to vector<8x36xf32>
    %14 = arith.mulf %11, %13 : vector<8x36xf32>
    %15 = arith.addf %3, %14 : vector<8x36xf32>
    %16 = vector.extract_strided_slice %1 {offsets = [0, 1], sizes = [8, 1], strides = [1, 1]} : vector<8x3xf32> to vector<8x1xf32>
    %17 = vector.broadcast %16 : vector<8x1xf32> to vector<8x36xf32>
    %18 = arith.mulf %0, %17 : vector<8x36xf32>
    %cst_7 = arith.constant -7.000000e+00 : f32
    %cst_8 = arith.constant 7.000000e+00 : f32
    %19 = vector.broadcast %cst_7 : f32 to vector<8x36xf32>
    %20 = arith.maximumf %19, %18 : vector<8x36xf32>
    %21 = vector.broadcast %cst_8 : f32 to vector<8x36xf32>
    %22 = arith.minimumf %21, %20 : vector<8x36xf32>
    %23 = math.roundeven %22 : vector<8x36xf32>
    %24 = vector.extract_strided_slice %2 {offsets = [0, 1], sizes = [8, 1], strides = [1, 1]} : vector<8x3xf32> to vector<8x1xf32>
    %25 = vector.broadcast %24 : vector<8x1xf32> to vector<8x36xf32>
    %26 = arith.mulf %23, %25 : vector<8x36xf32>
    %27 = arith.addf %15, %26 : vector<8x36xf32>
    %28 = vector.extract_strided_slice %1 {offsets = [0, 2], sizes = [8, 1], strides = [1, 1]} : vector<8x3xf32> to vector<8x1xf32>
    %29 = vector.broadcast %28 : vector<8x1xf32> to vector<8x36xf32>
    %30 = arith.mulf %0, %29 : vector<8x36xf32>
    %cst_9 = arith.constant -1.270000e+02 : f32
    %cst_10 = arith.constant 1.270000e+02 : f32
    %31 = vector.broadcast %cst_9 : f32 to vector<8x36xf32>
    %32 = arith.maximumf %31, %30 : vector<8x36xf32>
    %33 = vector.broadcast %cst_10 : f32 to vector<8x36xf32>
    %34 = arith.minimumf %33, %32 : vector<8x36xf32>
    %35 = math.roundeven %34 : vector<8x36xf32>
    %36 = vector.extract_strided_slice %2 {offsets = [0, 2], sizes = [8, 1], strides = [1, 1]} : vector<8x3xf32> to vector<8x1xf32>
    %37 = vector.broadcast %36 : vector<8x1xf32> to vector<8x36xf32>
    %38 = arith.mulf %35, %37 : vector<8x36xf32>
    %39 = arith.addf %27, %38 : vector<8x36xf32>
    %c0_11 = arith.constant 0 : index
    %c0_12 = arith.constant 0 : index
    %40 = vector.load %arg4[%c0_11, %c0_12] : memref<8x36xf32, #tpu.memory_space<vmem>>, vector<8x36xf32>
    tpu.vector_store %arg4[%c0_11, %c0_12], %39 {strides = array<i32>} : memref<8x36xf32, #tpu.memory_space<vmem>>, vector<8x36xf32>,
    return
  }
  func.func @transform_0(%arg0: i32) -> (i32, i32) {
    %c0_i32 = arith.constant 0 : i32
    %c0_i32_0 = arith.constant 0 : i32
    %c0_i32_1 = arith.constant 0 : i32
    return %c0_i32, %c0_i32_0 : i32, i32
  }
  func.func @transform_1(%arg0: i32) -> (i32, i32) {
    %c0_i32 = arith.constant 0 : i32
    %c0_i32_0 = arith.constant 0 : i32
    %c0_i32_1 = arith.constant 0 : i32
    return %c0_i32, %c0_i32_0 : i32, i32
  }
  func.func @transform_2(%arg0: i32) -> (i32, i32) {
    %c0_i32 = arith.constant 0 : i32
    %c0_i32_0 = arith.constant 0 : i32
    %c0_i32_1 = arith.constant 0 : i32
    return %c0_i32, %c0_i32_0 : i32, i32
  }
  func.func @transform_3(%arg0: i32) -> (i32, i32) {
    %c0_i32 = arith.constant 0 : i32
    %c0_i32_0 = arith.constant 0 : i32
    %c0_i32_1 = arith.constant 0 : i32
    return %c0_i32, %c0_i32_0 : i32, i32
  }
}

module attributes {stable_mosaic.version = 11 : i64} {
  func.func @_conv_matmul_kernel(%arg0: i32, %arg1: i32, %arg2: i32, %arg3: memref<8x36xbf16, #tpu.memory_space<vmem>>, %arg4: memref<8x1xf32, #tpu.memory_space<vmem>>, %arg5: memref<1x36x128xbf16, #tpu.memory_space<vmem>>, %arg6: memref<1x8x128xf32, #tpu.memory_space<vmem>>) attributes {dimension_semantics = [#tpu.dimension_semantics<parallel>, #tpu.dimension_semantics<parallel>, #tpu.dimension_semantics<parallel>], iteration_bounds = array<i64: 2, 1, 2>, scalar_prefetch = 0 : i64, scratch_operands = 0 : i64, tpu.core_type = #tpu.core_type<tc>, window_params = [{transform_indices = @transform_0, window_bounds = array<i64: 8, 36>}, {transform_indices = @transform_1, window_bounds = array<i64: 8, 1>}, {transform_indices = @transform_2, window_bounds = array<i64: 1, 36, 128>}, {transform_indices = @transform_3, window_bounds = array<i64: 1, 8, 128>}]} {
    %c0 = arith.constant 0 : index
    %c0_0 = arith.constant 0 : index
    %0 = vector.load %arg3[%c0, %c0_0] : memref<8x36xbf16, #tpu.memory_space<vmem>>, vector<8x36xbf16>
    %c0_1 = arith.constant 0 : index
    %c0_2 = arith.constant 0 : index
    %c0_3 = arith.constant 0 : index
    %1 = vector.load %arg5[%c0_1, %c0_2, %c0_3] : memref<1x36x128xbf16, #tpu.memory_space<vmem>>, vector<1x36x128xbf16>
    %2 = vector.shape_cast %1 : vector<1x36x128xbf16> to vector<36x128xbf16>
    %cst = arith.constant dense<0.000000e+00> : vector<8x128xf32>
    %3 = tpu.matmul %0, %2, %cst {dimension_numbers = #tpu.dot_dimension_numbers<[1], [0], [0], [1], [0, 0, 1, 1], [], []>} : vector<8x36xbf16>, vector<36x128xbf16>, vector<8x128xf32> -> vector<8x128xf32>
    %c0_4 = arith.constant 0 : index
    %c0_5 = arith.constant 0 : index
    %4 = vector.load %arg4[%c0_4, %c0_5] : memref<8x1xf32, #tpu.memory_space<vmem>>, vector<8x1xf32>
    %5 = vector.broadcast %4 : vector<8x1xf32> to vector<8x128xf32>
    %6 = arith.addf %3, %5 : vector<8x128xf32>
    %c0_6 = arith.constant 0 : index
    %c0_7 = arith.constant 0 : index
    %c0_8 = arith.constant 0 : index
    %7 = vector.load %arg6[%c0_6, %c0_7, %c0_8] : memref<1x8x128xf32, #tpu.memory_space<vmem>>, vector<1x8x128xf32>
    %8 = vector.shape_cast %7 : vector<1x8x128xf32> to vector<8x128xf32>
    %9 = vector.shape_cast %6 : vector<8x128xf32> to vector<1x8x128xf32>
    tpu.vector_store %arg6[%c0_6, %c0_7, %c0_8], %9 {strides = array<i32>} : memref<1x8x128xf32, #tpu.memory_space<vmem>>, vector<1x8x128xf32>,
    return
  }
  func.func @transform_0(%arg0: i32, %arg1: i32, %arg2: i32) -> (i32, i32) {
    %c0_i32 = arith.constant 0 : i32
    %c0_i32_0 = arith.constant 0 : i32
    return %arg1, %c0_i32 : i32, i32
  }
  func.func @transform_1(%arg0: i32, %arg1: i32, %arg2: i32) -> (i32, i32) {
    %c0_i32 = arith.constant 0 : i32
    %c0_i32_0 = arith.constant 0 : i32
    return %arg1, %c0_i32 : i32, i32
  }
  func.func @transform_2(%arg0: i32, %arg1: i32, %arg2: i32) -> (i32, i32, i32) {
    %c0_i32 = arith.constant 0 : i32
    %c0_i32_0 = arith.constant 0 : i32
    return %arg0, %c0_i32, %arg2 : i32, i32, i32
  }
  func.func @transform_3(%arg0: i32, %arg1: i32, %arg2: i32) -> (i32, i32, i32) {
    %c0_i32 = arith.constant 0 : i32
    return %arg0, %arg1, %arg2 : i32, i32, i32
  }
}

</mosaic_0001>

<bundles_post_ra>
// kernel: _lambda_.2
= control target key start
LH: loop header
LB: loop body
LE: loop exit
PB: predicated region body
PF: predicated region fallthrough
CT: control target
= control target key end

     0   :  { %v82_v0 = vmov 0   ;;  %v83_v1 = vmov 2   ;;  %v84_v4 = vmov 1   ;;  %vm61_vm0 = vcmask 293888   ;;  %s117_s1 = inlined_call_operand.vmem [shape: f32[8,3], index: 1, kind: input, shape index: {}]   ;;  %s118_s2 = inlined_call_operand.vmem [shape: f32[8,3], index: 2, kind: input, shape index: {}]   ;;  %s119_s0 = inlined_call_operand.vmem [shape: f32[8,36], index: 0, kind: input, shape index: {}]   ;;  %s120_s3 = inlined_call_operand.vmem [shape: f32[8,36], index: 3, kind: output, shape index: {}]  }
   0x1   :  { %76 = vset.pattern.permute.xlu0 %v82_v0  ;;  %78 = vset.pattern.permute.xlu1 %v83_v1  ;;  %v15_v2 = vld [vmem:[%s117_s1] sm:$0xff] }
   0x2   :  { %19 = vperm.xlu0 %76, %v15_v2   ;;  %48 = vperm.xlu1 %78, %v15_v2   ;;  %v16_v3 = vld [vmem:[%s118_s2] sm:$0xff] }
   0x3   :  { %v14_v5 = vld [vmem:[%s119_s0] sm:$0xff] }
   0x6   :  { %77 = vset.pattern.permute.xlu0 %v84_v4  ;;  %79 = vset.pattern.permute.xlu1 %v82_v0 }
   0x7   :  { %34 = vperm.xlu0 %77, %v15_v2   ;;  %28 = vperm.xlu1 %79, %v16_v3  }
   0xb   :  { %81 = vset.pattern.permute.xlu0 %v83_v1  ;;  %80 = vset.pattern.permute.xlu1 %v84_v4 }
   0xc   :  { %56 = vperm.xlu0 %81, %v16_v3   ;;  %42 = vperm.xlu1 %80, %v16_v3  }
  0x81   :  { %v20_v6 = vpop.permute.xlu0 %19  ;;  %v49_v7 = vpop.permute.xlu1 %48 }
  0x82   :  { %v22_v8 = vmul.f32 %v20_v6, %v14_v5  ;;  %v51_v10 = vmul.f32 %v49_v7, %v14_v5 }
  0x84   :  { %v67_v9 = vclamps-f32 %v22_v8, 1.0  ;;  %v69_v15 = vclamps-f32 %v51_v10, 127.0 }
  0x86   :  { %v35_v11 = vpop.permute.xlu0 %34  ;;  %v29_v12 = vpop.permute.xlu1 %28  ;;  %v70_v14 = vround.rtne.f32 %v67_v9  ;;  %v72_v20 = vround.rtne.f32 %v69_v15 }
  0x87   :  { %v37_v13 = vmul.f32 %v35_v11, %v14_v5 }
  0x88   :  { %v31_v21 = vmul.f32 %v70_v14, %v29_v12 }
  0x89   :  { %v68_v16 = vclamps-f32 %v37_v13, 7.0 }
  0x8b   :  { %v71_v17 = vround.rtne.f32 %v68_v16  ;;  %v43_v18 = vpop.permute.xlu1 %42  ;;  %v57_v19 = vpop.permute.xlu0 %56 }
  0x8c   :  { %v59_v23 = vmul.f32 %v72_v20, %v57_v19 }
  0x8d   :  { %v45_v22 = vmul.f32 %v71_v17, %v43_v18 }
  0x8f   :  { %v46_v24 = vadd.f32 %v45_v22, %v31_v21 }
  0x91   :  { %v60_v25 = vadd.f32 %v59_v23, %v46_v24 }
  0x93   :  { %62 = vst.msk [vmem:[%s120_s3] sm:$0xff] %vm61_vm0, %v60_v25 }

// kernel: _lambda_.3
= control target key start
LH: loop header
LB: loop body
LE: loop exit
PB: predicated region body
PF: predicated region fallthrough
CT: control target
= control target key end

     0   :  { %s693_s12 = smov 0   ;;  %s695_s13 = smov 0   ;;  %s790_s0 = inlined_call_operand.vmem [shape: bf16[8,36], index: 0, kind: input, shape index: {}]   ;;  %s791_s1 = inlined_call_operand.vmem [shape: f32[8,1], index: 1, kind: input, shape index: {}]   ;;  %s792_s2 = inlined_call_operand.vmem [shape: bf16[2,36,256], index: 2, kind: input, shape index: {}]   ;;  %s793_s3 = inlined_call_operand.vmem [shape: f32[2,8,256], index: 3, kind: output, shape index: {}]  }
   0x1   :  { %s697_s14 = smov 0   ;;  %s699_s15 = smov 0  }
   0x2   :  { %s701_s16 = smov 0   ;;  %s703_s17 = smov 0  }
   0x3   :  { %s705_s18 = smov 0  }
   0x4 LB: > { %s25_s19 = sadd.s32 1, %s660_s16  ;;  %s32_s20 = sadd.s32 1, %s664_s17  ;;  %s668_s18 = sphi %s705_s18, %s13_s18   ;;  %s664_s17 = sphi %s703_s17, %s799_s17   ;;  %s660_s16 = sphi %s701_s16, %s798_s16   ;;  %s656_s15 = sphi %s699_s15, %s797_s15   ;;  %s652_s14 = sphi %s697_s14, %s796_s14   ;;  %s648_s13 = sphi %s695_s13, %s795_s13   ;;  %s644_s12 = sphi %s693_s12, %s794_s12  }
   0x5   : > { %p26_p0 = scmp.ge.s32.totalorder %s25_s19, 2  ;;  %p100_p1 = scmp.ne.s32.totalorder %s648_s13, %s644_s12 }
   0x6   : > { %p101_p2 = scmp.eq.s32.totalorder %s668_s18, 0  ;;  %s93_s24 = sadd.s32 1, %s648_s13 }
   0x7   : > { %s801_s19 = smov (%p26_p0, %s25_s19), 0  ;;  %s803_s20 = smov (!%p26_p0, %s32_s20), %s664_s17 }
   0x8   : > { %p102_p3 = por %p101_p2, %p100_p1  ;;  %p34_p4 = scmp.ge.s32.totalorder %s803_s20, 2 }
   0x9   : > { %s89_s21 = ssub.s32 %s660_s16, %s801_s19  ;;  %p523_p6 = scmp.ge.s32.totalorder %s668_s18, 4 }
   0xa   : > { %s805_s20 = smov (%p34_p4, %s803_s20), 0 }
   0xb   : > { %s88_s22 = ssub.s32 %s664_s17, %s805_s20  ;;  %170 = sbr.rel (%p523_p6) target bundleno = 28 (0x1c), region = 24 }
   0xc   : > { %s90_s23 = sor.u32 %s89_s21, %s88_s22 }
   0xd   : > { %p91_p5 = scmp.eq.s32.totalorder %s90_s23, 0 }
   0xf   : > { %s744_s25 = scalar_select %p91_p5, %s648_s13, %s93_s24  }
  0x12   : > { %173 = sbr.rel (!%p102_p3) target bundleno = 28 (0x1c), region = 28  ;;  %s175_s26 = sand.u32 (%p102_p3), 1, %s648_s13  }
  0x13   : > { %s549_s27 = smul.u32 (%p102_p3), 10, %s664_s17 }
  0x14   : > { %s548_s28 = smul.u32 (%p102_p3), 20, %s175_s26 }
  0x15   : > { %s179_s29 = sadd.s32 (%p102_p3), %s660_s16, %s549_s27 }
  0x16   : > { %s524_s30 = sshll.u32 (%p102_p3), %s179_s29, 2  ;;  %s177_s7 = scalar_lea.vmem (%p102_p3), [#allocation2], %s548_s28 }
  0x17   : > { %s181_s6 = scalar_lea.vmem (%p102_p3), %s792_s2, %s524_s30 }
  0x18   : > { %v197_v0 = vld [vmem:[%s181_s6] sm:$0xf] (%p102_p3)  ;;  %v199_v1 = vld [vmem:[%s181_s6 + $0x8] sm:$0xf] (%p102_p3)  ;;  %v201_v2 = vld [vmem:[%s181_s6 + $0x10] sm:$0xf] (%p102_p3) }
  0x19   : > { %198 = vst [vmem:[%s177_s7] sm:$0xf] %v197_v0  ;;  %200 = vst [vmem:[%s177_s7 + $0x4] sm:$0xf] %v199_v1  ;;  %v203_v3 = vld [vmem:[%s181_s6 + $0x18] sm:$0xf] }
  0x1a   : > { %202 = vst [vmem:[%s177_s7 + $0x8] sm:$0xf] %v201_v2  ;;  %v205_v4 = vld [vmem:[%s181_s6 + $0x20] sm:$0xf]  ;;  %204 = vst [vmem:[%s177_s7 + $0xc] sm:$0xf] %v203_v3 }
  0x1b   : > { %206 = vst [vmem:[%s177_s7 + $0x10] sm:$0xf] %v205_v4 }
  0x1c PF: > { %p525_p7 = scmp.ge.s32.totalorder %s668_s18, 1  ;;  %p238_p8 = scmp.lt.s32.totalorder %s668_s18, 5 }
  0x1e   : > { %p239_p9 = pnand %p525_p7, %p238_p8 }
  0x1f   : > { %s245_s8 = sand.u32 (!%p239_p9), 1, %s644_s12   ;;  %v670_v5 = vmov (!%p239_p9), 0.0   ;;  %vm671_vm0 = vmmov (!%p239_p9), 0   ;;  %v310_v6 = vld [vmem:[%s791_s1] sm:$0xff] (!%p239_p9)  ;;  %v672_v7 = vmov (!%p239_p9), 0   ;;  %vm335_vm1 = vcmask (!%p239_p9), 1041408  }
  0x20   : > { %242 = sbr.rel (%p239_p9) target bundleno = 263 (0x107), region = 69  ;;  %538 = vmatprep.subr.bf16.mxu0 (!%p239_p9), %v670_v5  ;;  %544 = vmatprep.mubr.msk.bf16.mxu0 (!%p239_p9), %vm671_vm0, %v670_v5  ;;  %v304_v12 = vld [vmem:[%s790_s0] sm:$0xf] (!%p239_p9)  ;;  %vm331_vm2 = vcmask (!%p239_p9), 293888   ;;  %p291_p10 = scmp.lt.s32.totalorder (!%p239_p9), %s656_s15, 1 }
  0x21   : > { %s550_s9 = smul.u32 (!%p239_p9), 20, %s245_s8  ;;  %610 = vset.pattern.permute.xlu0 (!%p239_p9), %v672_v7  ;;  %p295_p11 = scmp.lt.s32.totalorder (!%p239_p9), %s652_s14, 1 }
  0x22   : > { %313 = vperm.xlu0 (!%p239_p9), %610, %v310_v6  }
  0x23   : > { %s247_s21 = scalar_lea.vmem (!%p239_p9), [#allocation2], %s550_s9 }
  0x24   : > { %v611_v8 = vld [vmem:[%s247_s21] sm:$0xff] (!%p239_p9)   ;;  %v612_v9 = vld [vmem:[%s247_s21 + $0x8] sm:$0xff] (!%p239_p9)   ;;  %v613_v10 = vld [vmem:[%s247_s21 + $0x10] ss:$0 sps:$4 sm:$0x33] (!%p239_p9)  }
  0x25   : > { %539 = vmatpush3.bf16.msra.mxu0 (!%p239_p9), %v611_v8  ;;  %v337_v11 = vsel (!%p239_p9), %vm335_vm1, %v613_v10, 0 }
  0x26   : > { %540 = vmatprep.subr.bf16.mxu0 (!%p239_p9), %v670_v5 }
  0x27   : > { %s807_s15 = smov (!%p291_p10, %s656_s15), 1  ;;  %s809_s14 = smov (!%p295_p11, %s652_s14), 1 }
  0x28   : > { %s526_s23 = sshll.u32 %s807_s15, 1 }
  0x29   : > { %541 = vmatpush3.bf16.msra.mxu0 %v612_v9  ;;  %s300_s24 = sadd.s32 %s526_s23, %s809_s14 }
  0x2a   : > { %542 = vmatprep.subr.bf16.mxu0 %v670_v5  ;;  %s527_s26 = sshll.u32 %s300_s24, 3 }
  0x2b   : > { %s302_s29 = scalar_lea.vmem %s793_s3, %s527_s26 }
  0x2d   : > { %543 = vmatpush3.bf16.msra.mxu0 %v337_v11 }
  0x30   : > { %545 = vmatmul.mubr.msk.bf16.vlgmr.msra.gmra.mrb[0].mxu0 %vm331_vm2, %v304_v12 }
  0xa1   : > { %v314_v13 = vpop.permute.xlu0 %313 }
 0x103   : > { %v373_v14 = vpop.f32.mrb[0].mxu0 }
 0x104   : > { %v374_v15 = vadd.f32 %v373_v14, %v314_v13  ;;  %v546_v16 = vpop.f32.mrb[1].mxu0 }
 0x105   : > { %v376_v17 = vpop.f32.mrb[2].mxu0 }
 0x106   : > { %379 = vst [vmem:[%s302_s29] sm:$0xff] %v374_v15  ;;  %v547_v18 = vpop.f32.mrb[3].mxu0 }
 0x107 PF: > { %s13_s18 = sadd.s32 1, %s668_s18   ;;  %s794_s12 = smov %s648_s13 }
 0x108   : > { %p10_p12 = scmp.ge.s32.totalorder %s13_s18, 6   ;;  %s795_s13 = smov %s744_s25 }
 0x109   : > { %s796_s14 = smov %s660_s16  ;;  %s797_s15 = smov %s664_s17 }
 0x10a   : > { %s798_s16 = smov %s801_s19  ;;  %s799_s17 = smov %s805_s20 }
 0x10b   :  { %12 = sbr.rel (!%p10_p12) target bundleno = 4 (0x4), region = 114 }

</bundles_post_ra>
